<compile_context>
chip_gen: v7x
topology: tpu7x:2x2x1
jax: 0.10.0
libtpu: 0.0.40
codegen_flags: <defaults>
</compile_context>

<pallas_src>
import math

import numpy as np
import jax
import jax.numpy as jnp
from jax.experimental import pallas as pl
from jax.experimental.pallas import tpu as pltpu


# ---------------------------------------------------------------------------
# Hardware-aware sizing helpers
# ---------------------------------------------------------------------------
_VMEM_CAP = None


def _vmem_cap():
    """Physical VMEM bytes per TensorCore (generation-aware, cached)."""
    global _VMEM_CAP
    if _VMEM_CAP is None:
        cap = None
        try:
            info = pltpu.get_tpu_info()
            cap = getattr(info, "vmem_capacity_bytes", None)
        except Exception:
            cap = None
        _VMEM_CAP = int(cap) if cap else (64 << 20)   # conservative: v7x per-TC
    return _VMEM_CAP


def _vmem_limit(footprint_bytes):
    """Scoped VMEM limit: cover the footprint, stay well under physical."""
    hi = int(0.7 * _vmem_cap())
    return int(min(hi, max(16 << 20, int(footprint_bytes))))


def _row_quantum(itemsize):
    # sublane quantum: 8 rows for f32, 16 for bf16, 32 for int8
    return 8 * max(1, 4 // max(1, int(itemsize)))


def _choose_row_tile(total_rows, row_bytes, itemsize, requested=None):
    """Row tile = full extent or a multiple of the sublane quantum, sized so a
    block is ~min(8 MiB, vmem_cap/12)."""
    q = _row_quantum(itemsize)
    if requested is None:
        target = min(8 << 20, max(1 << 20, _vmem_cap() // 12))
        t = max(q, int(target) // max(1, int(row_bytes)))
    else:
        t = int(requested)
    if t >= total_rows:
        return total_rows
    t = max(q, (t // q) * q)
    return total_rows if t >= total_rows else t


def _fold_factor(d):
    """k such that d*k is a multiple of 128 (lane-dense); 1 if already dense."""
    if d % 128 == 0:
        return 1
    return 128 // math.gcd(d, 128)


# ---------------------------------------------------------------------------
# Fused column mean / std (unbiased, matching torch.Tensor.std(dim=0))
# Single streaming pass over x_cts; tiled over rows; optional 2-core split.
# ---------------------------------------------------------------------------
def compute_col_stats(x_cts, *, tile_n=None, num_core_splits=2):
    """Pallas equivalent of col_means(x_cts), col_stds(x_cts) (no row_weights)."""
    n, d = x_cts.shape
    itemsize = np.dtype(x_cts.dtype).itemsize

    # Shift pivot = first row (close to the mean for real data) -> shifted sums
    # avoid catastrophic cancellation while still needing only one pass.
    shift = x_cts[0:1, :].astype(jnp.float32)                 # (1, d)

    # Lane folding: (n, d) -> (n/k, d*k) so the lane dim is a multiple of 128.
    k = _fold_factor(d)
    if k > 1:
        n_pad = ((n + k - 1) // k) * k
        if n_pad != n:
            # Pad rows are exact copies of row 0, so (row - shift) == 0 exactly
            # and they contribute nothing to either accumulator.
            # TODO(synk): for very large ragged N, peel the <k tail instead of
            # materializing a padded copy of x_cts.
            pad = jnp.broadcast_to(x_cts[0:1, :], (n_pad - n, d))
            x_f = jnp.concatenate([x_cts, pad], axis=0).reshape(n_pad // k, d * k)
        else:
            x_f = x_cts.reshape(n // k, d * k)
        shift_f = jnp.tile(shift, (1, k))
    else:
        x_f = x_cts
        shift_f = shift
    nf, df = x_f.shape

    tile_rows = _choose_row_tile(nf, df * itemsize, itemsize, tile_n)
    num_blocks = (nf + tile_rows - 1) // tile_rows

    # Split the reduction across TensorCores (helps v7x's 2 TCs; a harmless
    # sequential split on 1-TC chips).
    ncores = num_core_splits if num_blocks >= 2 else 1
    bpc = (num_blocks + ncores - 1) // ncores          # blocks per core
    has_excess = ncores * bpc > num_blocks             # clamped/skip blocks exist
    ragged = (nf % tile_rows) != 0                     # masked last block needed

    block_bytes = tile_rows * df * itemsize
    cparams = pltpu.CompilerParams(
        dimension_semantics=("parallel", "arbitrary"),
        vmem_limit_bytes=_vmem_limit(4 * block_bytes),
    )

    def _stats_kernel(x_ref, shift_ref, out_ref):
        c = pl.program_id(0)
        i = pl.program_id(1)
        bg = c * bpc + i                                # global row-block index

        @pl.when(i == 0)
        def _init():
            out_ref[...] = jnp.zeros_like(out_ref)

        def _accum(diff):
            s = jnp.sum(diff, axis=0, keepdims=True)            # (1, df)
            q = jnp.sum(diff * diff, axis=0, keepdims=True)     # (1, df)
            out_ref[...] += jnp.concatenate([s, q], axis=0)[None]   # (1, 2, df)

        def _body():
            diff = x_ref[...].astype(jnp.float32) - shift_ref[...]
            if ragged:
                @pl.when(bg == num_blocks - 1)
                def _tail():
                    rows = (jax.lax.broadcasted_iota(jnp.int32, diff.shape, 0)
                            + bg * tile_rows)
                    _accum(jnp.where(rows < nf, diff, 0.0))

                @pl.when(bg != num_blocks - 1)
                def _interior():
                    _accum(diff)                       # unmasked fast path
            else:
                _accum(diff)

        if has_excess:
            pl.when(bg < num_blocks)(_body)            # skip clamped extra blocks
        else:
            _body()

    partial = pl.pallas_call(
        _stats_kernel,
        out_shape=jax.ShapeDtypeStruct((ncores, 2, df), jnp.float32),
        grid=(ncores, bpc),
        in_specs=[
            pl.BlockSpec((tile_rows, df),
                         lambda c, i: (jnp.minimum(c * bpc + i, num_blocks - 1), 0)),
            pl.BlockSpec((1, df), lambda c, i: (0, 0)),
        ],
        out_specs=pl.BlockSpec((1, 2, df), lambda c, i: (c, 0, 0)),
        compiler_params=cparams,
    )(x_f, shift_f)

    # Tiny finalize (O(D)) in plain JAX: combine cores + fold groups, then
    # mean = shift + S/n ; var = (Q - S^2/n) / (n-1).
    combined = jnp.sum(partial, axis=0)                 # (2, df)
    sums = combined[0].reshape(k, d).sum(axis=0)         # (d,)
    sqs = combined[1].reshape(k, d).sum(axis=0)          # (d,)
    mean = shift[0] + sums / n
    if n > 1:
        var = (sqs - sums * sums / n) / (n - 1)
        std = jnp.sqrt(jnp.maximum(var, 0.0))            # NaN-preserving clamp
    else:
        std = jnp.full((d,), jnp.nan, dtype=jnp.float32)  # torch: std of 1 sample
    return mean.reshape(1, d), std.reshape(1, d)


# ---------------------------------------------------------------------------
# Forward pass: (x - mean) / std  ==  x * (1/std) + (-mean/std)
# ---------------------------------------------------------------------------
def std_layer_forward(x, mean, std, *, tile_b=None, out_dtype=None):
    b, d = x.shape
    mean = mean.reshape(1, d).astype(jnp.float32)
    std = std.reshape(1, d).astype(jnp.float32)

    # Output dtype follows the input for floating inputs (halves writeback for
    # bf16).  Pass out_dtype=jnp.float32 for strict torch promotion semantics.
    if out_dtype is None:
        out_dtype = x.dtype if jnp.issubdtype(x.dtype, jnp.floating) else jnp.float32

    # Hoisted tiny (1, D) preprocessing: per-element divide -> FMA.
    # TODO(synk): std == 0 (constant column) yields inf/nan exactly like torch.
    scale = 1.0 / std
    shift = -mean * scale

    # Lane folding (pad ragged B to a multiple of k so stores stay lane-dense).
    k = _fold_factor(d)
    if k > 1:
        b_pad = ((b + k - 1) // k) * k
        if b_pad != b:
            # TODO(synk): for very large ragged B, peel the <k tail instead of a
            # padded copy of x.
            x = jnp.concatenate([x, jnp.zeros((b_pad - b, d), x.dtype)], axis=0)
        xf = x.reshape(b_pad // k, d * k)
        scale_f = jnp.tile(scale, (1, k))
        shift_f = jnp.tile(shift, (1, k))
    else:
        b_pad = b
        xf, scale_f, shift_f = x, scale, shift

    bf, df = xf.shape
    in_isz = np.dtype(x.dtype).itemsize
    out_isz = np.dtype(out_dtype).itemsize
    tile_rows = _choose_row_tile(bf, df * in_isz, in_isz, tile_b)
    num_blocks = (bf + tile_rows - 1) // tile_rows

    def _fwd_kernel(x_ref, scale_ref, shift_ref, o_ref):
        xv = x_ref[...].astype(jnp.float32)              # (tile_rows, df)
        o_ref[...] = (xv * scale_ref[...] + shift_ref[...]).astype(o_ref.dtype)

    # Footprint: double-buffered input + output blocks + tiny (1, df) params.
    block_bytes = tile_rows * df * (in_isz + out_isz)
    out = pl.pallas_call(
        _fwd_kernel,
        out_shape=jax.ShapeDtypeStruct((bf, df), out_dtype),
        grid=(num_blocks,),
        in_specs=[
            pl.BlockSpec((tile_rows, df), lambda i: (i, 0)),
            pl.BlockSpec((1, df), lambda i: (0, 0)),
            pl.BlockSpec((1, df), lambda i: (0, 0)),
        ],
        out_specs=pl.BlockSpec((tile_rows, df), lambda i: (i, 0)),
        compiler_params=pltpu.CompilerParams(
            dimension_semantics=("parallel",),
            vmem_limit_bytes=_vmem_limit(3 * block_bytes),
        ),
    )(xf, scale_f, shift_f)

    out = out.reshape(b_pad, d)
    if b_pad != b:
        out = out[:b]
    return out


# ---------------------------------------------------------------------------
# Module-like wrapper
# ---------------------------------------------------------------------------
class StdLayer:
    """Pallas port of the PyTorch StdLayer.

    __init__ computes and stores column means / unbiased stds of x_cts
    (the registered buffers); forward applies (x - mean) / std.
    """

    def __init__(self, x_cts):
        self.mean, self.std = compute_col_stats(x_cts)   # each (1, D) float32

    def __call__(self, x):
        return std_layer_forward(x, self.mean, self.std)


if __name__ == "__main__":
    key = jax.random.PRNGKey(0)
    k1, k2, k3, k4, k5, k6 = jax.random.split(key, 6)

    # --- Case 1: module-sized toy shapes (D=32 -> lane-folded x4) ------------
    N, D, B = 64, 32, 8
    x_cts = jax.random.normal(k1, (N, D), dtype=jnp.float32) * 3.0 + 1.5
    x = jax.random.normal(k2, (B, D), dtype=jnp.float32) * 3.0 + 1.5

    layer = StdLayer(x_cts)
    out = jax.block_until_ready(layer(x))

    ref_mean = jnp.mean(x_cts, axis=0, keepdims=True)
    ref_std = jnp.std(x_cts, axis=0, ddof=1, keepdims=True)
    ref = (x - ref_mean) / ref_std

    assert out.shape == (B, D) and out.dtype == jnp.float32
    assert jnp.allclose(layer.mean, ref_mean, rtol=1e-5, atol=1e-5), "mean mismatch"
    assert jnp.allclose(layer.std, ref_std, rtol=1e-5, atol=1e-5), "std mismatch"
    assert jnp.allclose(out, ref, rtol=1e-5, atol=1e-5), "forward mismatch"

    # --- Case 2: ragged N (pad + masked tail + 2-core split + multi-block
    #     reduction) and ragged B forward, with a large column mean -----------
    N2, B2 = 70, 10
    x_cts2 = jax.random.normal(k3, (N2, D), dtype=jnp.float32) * 2.0 + 100.0
    x2 = jax.random.normal(k4, (B2, D), dtype=jnp.float32) * 2.0 + 100.0

    m2, s2 = compute_col_stats(x_cts2, tile_n=8)            # 3 blocks over 2 cores
    o2 = jax.block_until_ready(std_layer_forward(x2, m2, s2))

    r_m2 = jnp.mean(x_cts2, axis=0, keepdims=True)
    r_s2 = jnp.std(x_cts2, axis=0, ddof=1, keepdims=True)
    r2 = (x2 - r_m2) / r_s2
    assert o2.shape == (B2, D)
    assert jnp.allclose(m2, r_m2, rtol=1e-5, atol=1e-4), "tiled mean mismatch"
    assert jnp.allclose(s2, r_s2, rtol=1e-4, atol=1e-4), "tiled std mismatch"
    assert jnp.allclose(o2, r2, rtol=1e-4, atol=1e-4), "tiled forward mismatch"

    # --- Case 3: D multiple of 128 (no fold) + bf16 forward input/output -----
    N3, D3, B3 = 48, 128, 16
    x_cts3 = jax.random.normal(k5, (N3, D3), dtype=jnp.float32) + 0.5
    x3 = (jax.random.normal(k6, (B3, D3), dtype=jnp.float32) + 0.5).astype(jnp.bfloat16)

    m3, s3 = compute_col_stats(x_cts3)
    o3 = jax.block_until_ready(std_layer_forward(x3, m3, s3))
    r3 = (x3.astype(jnp.float32) - jnp.mean(x_cts3, 0)) / jnp.std(x_cts3, 0, ddof=1)
    assert o3.dtype == jnp.bfloat16 and o3.shape == (B3, D3)
    assert jnp.allclose(o3.astype(jnp.float32), r3, rtol=0.03, atol=0.03), "bf16 fwd mismatch"

    print("KERNEL_OK")
</pallas_src>

<mosaic_0001>
module attributes {stable_mosaic.version = 11 : i64} {
  func.func @_stats_kernel(%arg0: i32, %arg1: i32, %arg2: memref<16x128xf32, #tpu.memory_space<vmem>>, %arg3: memref<1x128xf32, #tpu.memory_space<vmem>>, %arg4: memref<1x2x128xf32, #tpu.memory_space<vmem>>) attributes {dimension_semantics = [#tpu.dimension_semantics<parallel>, #tpu.dimension_semantics<arbitrary>], iteration_bounds = array<i64: 1, 1>, scalar_prefetch = 0 : i64, scratch_operands = 0 : i64, tpu.core_type = #tpu.core_type<tc>, window_params = [{transform_indices = @transform_0, window_bounds = array<i64: 16, 128>}, {pipeline_mode = #tpu.pipeline_mode<synchronous>, transform_indices = @transform_1, window_bounds = array<i64: 1, 128>}, {transform_indices = @transform_2, window_bounds = array<i64: 1, 2, 128>}]} {
    %c0_i32 = arith.constant 0 : i32
    %0 = arith.cmpi eq, %arg1, %c0_i32 : i32
    %1 = arith.extui %0 : i1 to i32
    %c0_i32_0 = arith.constant 0 : i32
    %2 = arith.cmpi ne, %1, %c0_i32_0 : i32
    scf.if %2 {
      %cst_11 = arith.constant 0.000000e+00 : f32
      %17 = vector.broadcast %cst_11 : f32 to vector<1x2x128xf32>
      %c0_12 = arith.constant 0 : index
      %c0_13 = arith.constant 0 : index
      %c0_14 = arith.constant 0 : index
      %18 = vector.load %arg4[%c0_12, %c0_13, %c0_14] : memref<1x2x128xf32, #tpu.memory_space<vmem>>, vector<1x2x128xf32>
      tpu.vector_store %arg4[%c0_12, %c0_13, %c0_14], %17 {strides = array<i32>} : memref<1x2x128xf32, #tpu.memory_space<vmem>>, vector<1x2x128xf32>,
    } else {
    }
    %c0 = arith.constant 0 : index
    %c0_1 = arith.constant 0 : index
    %3 = vector.load %arg2[%c0, %c0_1] : memref<16x128xf32, #tpu.memory_space<vmem>>, vector<16x128xf32>
    %c0_2 = arith.constant 0 : index
    %c0_3 = arith.constant 0 : index
    %4 = vector.load %arg3[%c0_2, %c0_3] : memref<1x128xf32, #tpu.memory_space<vmem>>, vector<1x128xf32>
    %5 = vector.broadcast %4 : vector<1x128xf32> to vector<16x128xf32>
    %6 = arith.subf %3, %5 : vector<16x128xf32>
    %cst = arith.constant dense<0.000000e+00> : vector<128xf32>
    %7 = vector.multi_reduction <add>, %6, %cst [0] : vector<16x128xf32> to vector<128xf32>
    %8 = vector.shape_cast %7 : vector<128xf32> to vector<1x128xf32>
    %9 = arith.mulf %6, %6 : vector<16x128xf32>
    %cst_4 = arith.constant dense<0.000000e+00> : vector<128xf32>
    %10 = vector.multi_reduction <add>, %9, %cst_4 [0] : vector<16x128xf32> to vector<128xf32>
    %11 = vector.shape_cast %10 : vector<128xf32> to vector<1x128xf32>
    %c0_5 = arith.constant 0 : index
    %c0_6 = arith.constant 0 : index
    %c0_7 = arith.constant 0 : index
    %12 = vector.load %arg4[%c0_5, %c0_6, %c0_7] : memref<1x2x128xf32, #tpu.memory_space<vmem>>, vector<1x2x128xf32>
    %13 = tpu.concatenate %8, %11 in 0 : vector<1x128xf32>, vector<1x128xf32> -> vector<2x128xf32>
    %14 = vector.shape_cast %13 : vector<2x128xf32> to vector<1x2x128xf32>
    %15 = arith.addf %12, %14 : vector<1x2x128xf32>
    %c0_8 = arith.constant 0 : index
    %c0_9 = arith.constant 0 : index
    %c0_10 = arith.constant 0 : index
    %16 = vector.load %arg4[%c0_8, %c0_9, %c0_10] : memref<1x2x128xf32, #tpu.memory_space<vmem>>, vector<1x2x128xf32>
    tpu.vector_store %arg4[%c0_8, %c0_9, %c0_10], %15 {strides = array<i32>} : memref<1x2x128xf32, #tpu.memory_space<vmem>>, vector<1x2x128xf32>,
    return
  }
  func.func @transform_0(%arg0: i32, %arg1: i32) -> (i32, i32) {
    %c1_i32 = arith.constant 1 : i32
    %0 = arith.muli %arg0, %c1_i32 : i32
    %1 = arith.addi %0, %arg1 : i32
    %c0_i32 = arith.constant 0 : i32
    %2 = arith.minsi %1, %c0_i32 : i32
    %c0_i32_0 = arith.constant 0 : i32
    %c0_i32_1 = arith.constant 0 : i32
    return %2, %c0_i32_0 : i32, i32
  }
  func.func @transform_1(%arg0: i32, %arg1: i32) -> (i32, i32) {
    %c0_i32 = arith.constant 0 : i32
    %c0_i32_0 = arith.constant 0 : i32
    %c0_i32_1 = arith.constant 0 : i32
    return %c0_i32, %c0_i32_0 : i32, i32
  }
  func.func @transform_2(%arg0: i32, %arg1: i32) -> (i32, i32, i32) {
    %c0_i32 = arith.constant 0 : i32
    %c0_i32_0 = arith.constant 0 : i32
    %c0_i32_1 = arith.constant 0 : i32
    return %arg0, %c0_i32, %c0_i32_0 : i32, i32, i32
  }
}

</mosaic_0001>

<bundles_post_ra>
// kernel: tpu_custom_call.1
= control target key start
LH: loop header
LB: loop body
LE: loop exit
PB: predicated region body
PF: predicated region fallthrough
CT: control target
= control target key end

     0   :  { %7 = vsyncpa [#allocation3], 0  ;;  %s191_s0 = inlined_call_operand.hbm [shape: f32[16,128], index: 0, kind: input, shape index: {}]   ;;  %s192_s1 = inlined_call_operand.vmem [shape: f32[1,128], index: 1, kind: input, shape index: {}]   ;;  %s193_s2 = inlined_call_operand.hbm [shape: f32[1,2,128], index: 2, kind: output, shape index: {}]  }
   0x1   :  { %8 = vsyncpa [#allocation4], 0  ;;  %s144_s9 = smov [#allocation2]   ;;  %s96_s13 = scalar_lea.hbm %s191_s0, 256 }
   0x2   :  { %s20_s10 = sshll.u32 %s144_s9, 4  ;;  %p97_p0 = scmp.ne.s32.totalorder %s191_s0, %s96_s13  ;;  %s21_s10 = int_to_ptr.vmem [resolvable:$true] %s20_s10 }
   0x3   :  { %p100_p1 = scmp.lt.u32.totalorder %s96_s13, %s191_s0 }
   0x5   :  { %p102_p2 = pnand %p100_p1, %p97_p0 }
   0x7   :  { %105 = shalt.err (!%p102_p2)
}
   0x8   :  { %s106_s18 = scalar_lea.vmem %s21_s10, 256  ;;  %p111_p4 = scmp.lt.s32.totalorder %s21_s10, %s21_s10 }
   0x9   :  { %p107_p3 = scmp.ne.s32.totalorder %s21_s10, %s106_s18  ;;  %p112_p5 = scmp.lt.s32.totalorder %s106_s18, %s106_s18 }
   0xb   :  { %p113_p6 = por %p112_p5, %p111_p4 }
   0xd   :  { %p114_p7 = pnand %p113_p6, %p107_p3 }
   0xf   :  { %117 = shalt.err (!%p114_p7)
}
  0x10   :  { %s145_s19 = smov 128   ;;  %s146_s20 = smov 8  }
  0x11   :  { %26 = dma.hbm_to_vmem [thread:$0]  %s191_s0, 256, %s21_s10, [#allocation3], %s145_s19, %s145_s19, %s146_s20  }
  0x12   :  { %140 = dma.done.wait [#allocation3], 256  }
  0x13   :  { %141 = vsyncadd [#allocation3], 4294967040  ;;  %v147_v0 = vmov 0.0   ;;  %v41_v1 = vld [vmem:[#allocation2] sm:$0xff]  ;;  %v42_v2 = vld [vmem:[#allocation2 + $0x8] sm:$0xff]  ;;  %vm69_vm0 = vcmask 1040384  }
  0x14   :  { %40 = vst [vmem:[#allocation5] sm:$0x3] %v147_v0  ;;  %v90_v3 = vld [vmem:[%s192_s1] ss:$0 sm:$0xff]  ;;  %s148_s0 = smov [#allocation5]  }
  0x15   :  { %v50_v4 = vsub.f32 %v41_v1, %v90_v3  ;;  %v51_v5 = vsub.f32 %v42_v2, %v90_v3  ;;  %s79_s1 = sshll.u32 %s148_s0, 4  ;;  %s80_s1 = int_to_ptr.vmem [resolvable:$true] %s79_s1 }
  0x16   :  { %s118_s25 = scalar_lea.vmem %s80_s1, 32  ;;  %p123_p9 = scmp.lt.s32.totalorder %s80_s1, %s80_s1 }
  0x17   :  { %v52_v6 = vadd.f32 %v51_v5, %v50_v4  ;;  %v59_v7 = vmul.f32 %v50_v4, %v50_v4  ;;  %v60_v8 = vmul.f32 %v51_v5, %v51_v5  ;;  %p119_p8 = scmp.ne.s32.totalorder %s80_s1, %s118_s25  ;;  %p124_p10 = scmp.lt.s32.totalorder %s118_s25, %s118_s25 }
  0x19   :  { %v53_v9 = vrot.slane %v52_v6, 4  ;;  %v61_v10 = vadd.f32 %v60_v8, %v59_v7  ;;  %p125_p11 = por %p124_p10, %p123_p9 }
  0x1b   :  { %v54_v11 = vadd.f32 %v53_v9, %v52_v6  ;;  %v62_v12 = vrot.slane %v61_v10, 4  ;;  %v68_v22 = vld [vmem:[#allocation5] sm:$0x3]  ;;  %p126_p12 = pnand %p125_p11, %p119_p8 }
  0x1d   :  { %v55_v13 = vrot.slane %v54_v11, 2  ;;  %v63_v14 = vadd.f32 %v62_v12, %v61_v10 }
  0x1f   :  { %v56_v15 = vadd.f32 %v55_v13, %v54_v11  ;;  %v64_v16 = vrot.slane %v63_v14, 2 }
  0x21   :  { %v57_v17 = vrot.slane %v56_v15, 1  ;;  %v65_v18 = vadd.f32 %v64_v16, %v63_v14 }
  0x23   :  { %v58_v19 = vadd.f32 %v57_v17, %v56_v15  ;;  %v66_v20 = vrot.slane %v65_v18, 1 }
  0x25   :  { %v67_v21 = vadd.f32 %v66_v20, %v65_v18 }
  0x27   :  { %v70_v23 = vsel %vm69_vm0, %v58_v19, %v67_v21 }
  0x28   :  { %v71_v24 = vadd.f32 %v70_v23, %v68_v22 }
  0x2a   :  { %72 = vst [vmem:[#allocation5] sm:$0x3] %v71_v24 }
  0x2b   :  { %129 = shalt.err (!%p126_p12)
}
  0x2c   :  { %s130_s28 = scalar_lea.hbm %s193_s2, 32 }
  0x2d   :  { %p131_p13 = scmp.ne.s32.totalorder %s193_s2, %s130_s28  ;;  %p134_p0 = scmp.lt.u32.totalorder %s130_s28, %s193_s2 }
  0x2f   :  { %p136_p1 = pnand %p134_p0, %p131_p13 }
  0x31   :  { %139 = shalt.err (!%p136_p1)
}
  0x32   :  { %82 = dma.vmem_to_hbm [thread:$0]  %s80_s1, 32, %s193_s2, [#allocation4]  }
  0x33   :  { %142 = dma.done.wait [#allocation4], 32  }
  0x34   :  { %143 = vsyncadd [#allocation4], 4294967264 }
  0x35   :  { %86 = vsyncpa [#allocation3], 1 }
  0x36   :  { %87 = vsyncpa [#allocation4], 1 }

</bundles_post_ra>
